<compile_context>
chip_gen: v7x
topology: tpu7x:2x2x1
jax: 0.10.0
libtpu: 0.0.40
codegen_flags: <defaults>
</compile_context>

<pallas_src>
import jax
import jax.numpy as jnp
from jax.experimental import pallas as pl
from jax.experimental.pallas import tpu as pltpu

DEFAULT_THRESHOLD = 0.005


def _round_up(v, m):
    return ((v + m - 1) // m) * m


# ------------------------------ kernel ---------------------------------------


def _sfg_scale_kernel(x_ref, g_ref, o_ref):
    # Pure per-feature broadcast multiply; gate is already precomputed and
    # pre-cast to x.dtype in the wrapper.
    o_ref[...] = x_ref[...] * g_ref[...]


# ------------------------------ tiling helpers --------------------------------


def _vmem_capacity_bytes():
    """Physical VMEM per TensorCore; conservative fallback = v7x's 64 MiB."""
    try:
        cap = int(getattr(pltpu.get_tpu_info(), "vmem_capacity_bytes"))
        if cap > 0:
            return cap
    except Exception:
        pass
    return 64 * 1024 * 1024


def _vmem_budget():
    """Per-grid-step (x tile + out tile) byte budget and scoped-VMEM limit.

    Double-buffered working set ends up ~= half of physical VMEM:
      v5e/v6e (128 MiB): 24 MiB/step  -> limit 56 MiB
      v7x     ( 64 MiB): 16 MiB/step  -> limit 40 MiB
    """
    cap = _vmem_capacity_bytes()
    per_step = min(cap // 4, 24 * 1024 * 1024)
    vmem_limit = min(cap - 8 * 1024 * 1024, 2 * per_step + 8 * 1024 * 1024)
    return per_step, vmem_limit


def _pick_tile_m(m, n, itemsize, per_step_budget):
    """Row tile: multiple of 8 sublanes, sized so x+out tiles fit the budget,
    and split so the grid has >= 2 steps when possible (v7x 2-TC megacore)."""
    tm = per_step_budget // max(1, 2 * n * itemsize)
    tm = max(8, (tm // 8) * 8)
    if tm >= m:
        tm = _round_up(max(m, 1), 8)
    if m > 8 and pl.cdiv(m, tm) < 2:
        tm = max(8, _round_up(pl.cdiv(m, 2), 8))
    return tm


# ------------------------------ wrapper ---------------------------------------


def elementwise_sfg(x, task, f_base, mask_reals_F=None, f_list=None,
                    sfg_no_pb=False, threshold_fn="binarizer"):
    """Pallas forward of ElementWiseSFG.

    x            : (..., out_features)
    f_base       : (out_features,)                       -- module's F_base
    mask_reals_F : (task_num-1, out_features) real masks -- piggyback path
    f_list       : (task_num, out_features)              -- SFGnoPB path

    NOTE: task / sfg_no_pb / threshold_fn must be static Python values (they
    select the gate path and index the parameter lists, as in the module).
    """
    out_features = x.shape[-1]
    lead = x.shape[:-1]
    x2d = x.reshape(-1, out_features)
    M = x2d.shape[0]
    dtype = x2d.dtype
    itemsize = x2d.dtype.itemsize

    # ---- gate vector: tiny (out_features,) op, computed once in the wrapper.
    if sfg_no_pb:
        gate = f_list[task].astype(jnp.float32)
    elif task == 0:
        gate = f_base.astype(jnp.float32)
    else:
        m = mask_reals_F[task - 1].astype(jnp.float32)
        f = f_base.astype(jnp.float32)
        if threshold_fn == "binarizer":
            gate = jnp.where(m > DEFAULT_THRESHOLD, f, 0.0)
        else:  # ternarizer: {-1, 0, 1} folded into +/-F select
            gate = jnp.where(m > DEFAULT_THRESHOLD, f,
                             jnp.where(m < 0.0, -f, 0.0))
    gate2d = gate.reshape(1, out_features).astype(dtype)

    # ---- tiling (per-generation VMEM budget, no padding of x).
    per_step_budget, vmem_limit = _vmem_budget()
    tm = _pick_tile_m(M, out_features, itemsize, per_step_budget)
    grid = (pl.cdiv(M, tm),)

    x_spec = pl.BlockSpec((tm, out_features), lambda i: (i, 0))
    g_spec = pl.BlockSpec((1, out_features), lambda i: (0, 0))
    out_spec = pl.BlockSpec((tm, out_features), lambda i: (i, 0))
    out_shape = jax.ShapeDtypeStruct((M, out_features), dtype)

    cost = pl.CostEstimate(
        flops=M * out_features,
        transcendentals=0,
        bytes_accessed=2 * M * out_features * itemsize + out_features * itemsize,
    )
    cparams = pltpu.CompilerParams(
        dimension_semantics=("parallel",),
        vmem_limit_bytes=vmem_limit,
    )

    y = pl.pallas_call(
        _sfg_scale_kernel,
        out_shape=out_shape,
        grid=grid,
        in_specs=[x_spec, g_spec],
        out_specs=out_spec,
        compiler_params=cparams,
        cost_estimate=cost,
    )(x2d, gate2d)

    return y.reshape(*lead, out_features)


# ------------------------------ reference -------------------------------------


def reference(x, task, f_base, mask_reals_F=None, f_list=None,
              sfg_no_pb=False, threshold_fn="binarizer"):
    if sfg_no_pb:
        F = f_list[task]
    elif task == 0:
        F = f_base
    else:
        m = mask_reals_F[task - 1]
        if threshold_fn == "binarizer":
            g = jnp.where(m > DEFAULT_THRESHOLD, 1.0, 0.0)
        else:  # ternarizer
            g = jnp.where(m > DEFAULT_THRESHOLD, 1.0,
                          jnp.where(m < 0.0, -1.0, 0.0))
        F = g * f_base
    return x * F


# ------------------------------ demo / test ------------------------------------


if __name__ == "__main__":
    # Small shapes consistent with the module: (batch, seq, out_features),
    # out_features lane-dense (multiple of 128).
    batch, seq, out_features = 2, 8, 128
    task_num = 3
    mask_scale = 0.01  # config.mask_init == 'uniform', config.mask_scale == 0.01

    key = jax.random.PRNGKey(0)
    k_x, k_f, k_m, k_l, k_r = jax.random.split(key, 5)

    x = jax.random.normal(k_x, (batch, seq, out_features), jnp.float32)
    # Module inits F_base to ones; use random values so the multiply is exercised.
    f_base = jax.random.normal(k_f, (out_features,), jnp.float32)
    mask_reals_F = jax.random.uniform(
        k_m, (task_num - 1, out_features), jnp.float32,
        minval=-mask_scale, maxval=mask_scale)
    f_list = jax.random.normal(k_l, (task_num, out_features), jnp.float32)

    # task > 0, binarizer path (the default config).
    y1 = jax.block_until_ready(
        elementwise_sfg(x, 1, f_base, mask_reals_F=mask_reals_F))
    y1_ref = reference(x, 1, f_base, mask_reals_F=mask_reals_F)
    assert y1.shape == (batch, seq, out_features)
    assert jnp.allclose(y1, y1_ref, atol=1e-6, rtol=1e-6), "binarizer path mismatch"

    # task == 0 path (plain F_base scaling).
    y0 = jax.block_until_ready(
        elementwise_sfg(x, 0, f_base, mask_reals_F=mask_reals_F))
    y0_ref = reference(x, 0, f_base, mask_reals_F=mask_reals_F)
    assert jnp.allclose(y0, y0_ref, atol=1e-6, rtol=1e-6), "task-0 path mismatch"

    # task > 0, ternarizer path.
    y2 = jax.block_until_ready(
        elementwise_sfg(x, 2, f_base, mask_reals_F=mask_reals_F,
                        threshold_fn="ternarizer"))
    y2_ref = reference(x, 2, f_base, mask_reals_F=mask_reals_F,
                       threshold_fn="ternarizer")
    assert jnp.allclose(y2, y2_ref, atol=1e-6, rtol=1e-6), "ternarizer path mismatch"

    # SFGnoPB path (F = F_list[task]).
    y3 = jax.block_until_ready(
        elementwise_sfg(x, 1, f_base, f_list=f_list, sfg_no_pb=True))
    y3_ref = reference(x, 1, f_base, f_list=f_list, sfg_no_pb=True)
    assert jnp.allclose(y3, y3_ref, atol=1e-6, rtol=1e-6), "SFGnoPB path mismatch"

    # Ragged M (not a multiple of the row tile) exercises the boundary block
    # handling that replaced the old jnp.pad / slice.
    xr = jax.random.normal(k_r, (batch, 7, out_features), jnp.float32)
    yr = jax.block_until_ready(
        elementwise_sfg(xr, 1, f_base, mask_reals_F=mask_reals_F))
    yr_ref = reference(xr, 1, f_base, mask_reals_F=mask_reals_F)
    assert yr.shape == xr.shape
    assert jnp.allclose(yr, yr_ref, atol=1e-6, rtol=1e-6), "ragged-M mismatch"

    print("KERNEL_OK")
</pallas_src>

<mosaic_0001>
module attributes {stable_mosaic.version = 11 : i64} {
  func.func @_sfg_scale_kernel(%arg0: i32, %arg1: memref<8x128xf32, #tpu.memory_space<vmem>>, %arg2: memref<1x128xf32, #tpu.memory_space<vmem>>, %arg3: memref<8x128xf32, #tpu.memory_space<vmem>>) attributes {dimension_semantics = [#tpu.dimension_semantics<parallel>], iteration_bounds = array<i64: 2>, scalar_prefetch = 0 : i64, scratch_operands = 0 : i64, tpu.core_type = #tpu.core_type<tc>, window_params = [{transform_indices = @transform_0, window_bounds = array<i64: 8, 128>}, {pipeline_mode = #tpu.pipeline_mode<synchronous>, transform_indices = @transform_1, window_bounds = array<i64: 1, 128>}, {transform_indices = @transform_2, window_bounds = array<i64: 8, 128>}]} {
    %c0 = arith.constant 0 : index
    %c0_0 = arith.constant 0 : index
    %0 = vector.load %arg1[%c0, %c0_0] : memref<8x128xf32, #tpu.memory_space<vmem>>, vector<8x128xf32>
    %c0_1 = arith.constant 0 : index
    %c0_2 = arith.constant 0 : index
    %1 = vector.load %arg2[%c0_1, %c0_2] : memref<1x128xf32, #tpu.memory_space<vmem>>, vector<1x128xf32>
    %2 = vector.broadcast %1 : vector<1x128xf32> to vector<8x128xf32>
    %3 = arith.mulf %0, %2 : vector<8x128xf32>
    %c0_3 = arith.constant 0 : index
    %c0_4 = arith.constant 0 : index
    %4 = vector.load %arg3[%c0_3, %c0_4] : memref<8x128xf32, #tpu.memory_space<vmem>>, vector<8x128xf32>
    tpu.vector_store %arg3[%c0_3, %c0_4], %3 {strides = array<i32>} : memref<8x128xf32, #tpu.memory_space<vmem>>, vector<8x128xf32>,
    return
  }
  func.func @transform_0(%arg0: i32) -> (i32, i32) {
    %c0_i32 = arith.constant 0 : i32
    %c0_i32_0 = arith.constant 0 : i32
    return %arg0, %c0_i32 : i32, i32
  }
  func.func @transform_1(%arg0: i32) -> (i32, i32) {
    %c0_i32 = arith.constant 0 : i32
    %c0_i32_0 = arith.constant 0 : i32
    %c0_i32_1 = arith.constant 0 : i32
    return %c0_i32, %c0_i32_0 : i32, i32
  }
  func.func @transform_2(%arg0: i32) -> (i32, i32) {
    %c0_i32 = arith.constant 0 : i32
    %c0_i32_0 = arith.constant 0 : i32
    return %arg0, %c0_i32 : i32, i32
  }
}

</mosaic_0001>

<bundles_post_ra>
// kernel: tpu_custom_call.1
= control target key start
LH: loop header
LB: loop body
LE: loop exit
PB: predicated region body
PF: predicated region fallthrough
CT: control target
= control target key end

     0   :  { %7 = vsyncpa [#allocation3], 0  ;;  %s591_s0 = inlined_call_operand.hbm [shape: f32[16,128], index: 0, kind: input, shape index: {}]   ;;  %s592_s1 = inlined_call_operand.vmem [shape: f32[1,128], index: 1, kind: input, shape index: {}]   ;;  %s593_s2 = inlined_call_operand.hbm [shape: f32[16,128], index: 2, kind: output, shape index: {}]  }
   0x1   :  { %9 = vsyncpa [#allocation3 + $0x1], 0 }
   0x2   :  { %10 = vsyncpa [#allocation4], 0 }
   0x3   :  { %12 = vsyncpa [#allocation4 + $0x1], 0  ;;  %s427_s9 = smov 0   ;;  %s429_s10 = smov 0  }
   0x4   :  { %s431_s11 = smov 0   ;;  %s433_s12 = smov 0  }
   0x5 LB: > { %s448_s13 = sadd.s32 4294967295, %s408_s12   ;;  %s253_s14 = sadd.s32 4294967294, %s408_s12   ;;  %s408_s12 = sphi %s433_s12, %s608_s12   ;;  %s404_s11 = sphi %s431_s11, %s607_s11   ;;  %s400_s10 = sphi %s429_s10, %s606_s10   ;;  %s396_s9 = sphi %s427_s9, %s605_s9  }
   0x6   : > { %s452_s15 = sadd.s32 1, %s408_s12   ;;  %s25_s16 = sadd.s32 1, %s404_s11 }
   0x7   : > { %s22_s17 = ssub.s32 %s408_s12, %s452_s15  ;;  %p32_p0 = scmp.ne.s32.totalorder %s404_s11, %s400_s10 }
   0x8   : > { %p23_p1 = scmp.eq.s32.totalorder %s22_s17, 0  ;;  %p33_p2 = scmp.eq.s32.totalorder %s408_s12, 0 }
   0x9   : > { %p38_p3 = scmp.ne.s32.totalorder %s400_s10, %s396_s9  ;;  %p39_p4 = scmp.eq.s32.totalorder %s448_s13, 0 }
   0xa   : > { %s464_s18 = scalar_select %p23_p1, %s404_s11, %s25_s16  }
   0xb   : > { %p466_p5 = por %p33_p2, %p32_p0  ;;  %p470_p6 = por %p39_p4, %p38_p3 }
   0xc   : > { %p83_p7 = scmp.eq.s32.totalorder %s448_s13, 1  ;;  %p89_p8 = scmp.eq.s32.totalorder %s253_s14, 1 }
   0xd   : > { %p278_p10 = scmp.lt.s32.totalorder %s408_s12, 2  ;;  %s112_s23 = sand.u32 1, %s404_s11  }
   0xe   : > { %p477_p11 = por %p83_p7, %p32_p0  ;;  %p481_p12 = por %p89_p8, %p38_p3 }
   0xf   : > { %s257_s24 = sshll.u32 %s408_s12, 7  ;;  %s256_s25 = sshll.u32 %s112_s23, 3 }
  0x10   : > { %s597_s21 = scalar_select %p477_p11, 1, 0 }
  0x11   : > { %s598_s22 = scalar_select %p481_p12, 1, 0 }
  0x12   : > { %s490_s28 = scalar_lea.hbm %s591_s0, %s257_s24  ;;  %s116_s29 = scalar_lea.vmem [#allocation2], %s256_s25 }
  0x13   : > { %s123_s30 = sshll.u32 %s116_s29, 4  ;;  %p494_p13 = pnand %p278_p10, %p466_p5  ;;  %s498_s30 = int_to_ptr.vmem [resolvable:$true] %s123_s30 }
  0x14   : > { %s113_s4 = scalar_lea.sflag [#allocation3], %s112_s23  ;;  %s312_s5 = scalar_lea.hbm %s490_s28, 128 }
  0x15   : > { %p313_p2 = scmp.ne.s32.totalorder %s490_s28, %s312_s5  ;;  %p314_p3 = pneg %p494_p13 }
  0x16   : > { %s317_s8 = scalar_lea.hbm %s591_s0, 256  ;;  %p318_p5 = scmp.lt.u32.totalorder %s490_s28, %s591_s0 }
  0x17   : > { %p315_p4 = pnand %p314_p3, %p313_p2  ;;  %p319_p8 = scmp.lt.u32.totalorder %s317_s8, %s312_s5 }
  0x18   : > { %p321_p9 = scmp.lt.u32.totalorder %s312_s5, %s490_s28 }
  0x19   : > { %p316_p7 = pneg %p315_p4  ;;  %p320_p10 = por %p319_p8, %p318_p5 }
  0x1b   : > { %p322_p0 = por %p321_p9, %p320_p10 }
  0x1d   : > { %p323_p1 = pnand %p322_p0, %p316_p7 }
  0x1f   : > { %326 = shalt.err (!%p323_p1)
}
  0x20   : > { %s327_s17 = scalar_lea.vmem %s498_s30, 128  ;;  %s410_s19 = smov [#allocation2]  }
  0x21   : > { %p328_p2 = scmp.ne.s32.totalorder %s498_s30, %s327_s17  ;;  %s332_s23 = sshll.u32 %s410_s19, 4  ;;  %s333_s23 = int_to_ptr.vmem [resolvable:$false] %s332_s23 }
  0x22   : > { %s334_s24 = scalar_lea.vmem %s333_s23, 256  ;;  %p335_p11 = scmp.lt.s32.totalorder %s498_s30, %s333_s23 }
  0x23   : > { %p330_p4 = pnand %p328_p2, %p314_p3  ;;  %p336_p5 = scmp.lt.s32.totalorder %s334_s24, %s327_s17 }
  0x25   : > { %p331_p12 = pneg %p330_p4  ;;  %p337_p8 = por %p336_p5, %p335_p11 }
  0x27   : > { %p338_p9 = pnand %p337_p8, %p331_p12 }
  0x29   : > { %341 = shalt.err (!%p338_p9)
}
  0x2a   : > { %273 = dma.hbm_to_vmem [thread:$0]  (!%p494_p13), %s490_s28, 128, %s498_s30, %s113_s4  }
  0x2b   : > { %p600_p0 = scmp.lt.s32.totalorder %s408_s12, 3  ;;  %p601_p1 = scmp.ge.s32.totalorder %s408_s12, 1 }
  0x2d   : > { %p129_p3 = pnand %p601_p1, %p600_p0 }
  0x2e   : > { %s532_s25 = sand.u32 (!%p129_p3), 1, %s400_s10  }
  0x2f   : > { %132 = sbr.rel (%p129_p3) target bundleno = 81 (0x51), region = 28  ;;  %s259_s26 = sshll.u32 (!%p129_p3), %s532_s25, 3 }
  0x30   : > { %s135_s27 = scalar_lea.sflag (!%p129_p3), [#allocation3], %s532_s25  ;;  %s138_s29 = scalar_lea.vmem (!%p129_p3), [#allocation2], %s259_s26 }
  0x36   : > { %387 = dma.done.wait (%p470_p6), %s135_s27, 128  }
  0x37   : > { %389 = vsyncadd (%p470_p6), %s135_s27, 4294967168  ;;  %s158_s28 = scalar_lea.vmem [#allocation5], %s259_s26  ;;  %s263_s3 = sshll.u32 %s448_s13, 7  ;;  %v159_v0 = vld [vmem:[%s138_s29] sm:$0xff] }
  0x38   : > { %s183_s30 = sshll.u32 %s158_s28, 4  ;;  %v261_v1 = vld [vmem:[%s592_s1] ss:$0 sm:$0xff]  ;;  %s549_s20 = scalar_lea.hbm %s593_s2, %s263_s3  ;;  %s544_s30 = int_to_ptr.vmem [resolvable:$true] %s183_s30 }
  0x39   : > { %v167_v2 = vmul.f32 %v261_v1, %v159_v0  ;;  %s170_s8 = scalar_lea.sflag [#allocation4], %s532_s25  ;;  %s342_s14 = scalar_lea.vmem %s544_s30, 128 }
  0x3a   : > { %p343_p6 = scmp.ne.s32.totalorder %s544_s30, %s342_s14  ;;  %p602_p11 = scmp.ne.s32.totalorder %s597_s21, 0 }
  0x3b   : > { %168 = vst [vmem:[%s158_s28] sm:$0xff] %v167_v2  ;;  %s411_s13 = smov [#allocation5]  }
  0x3c   : > { %p344_p12 = pnand %p343_p6, %p602_p11  ;;  %s346_s16 = sshll.u32 %s411_s13, 4  ;;  %s347_s16 = int_to_ptr.vmem [resolvable:$false] %s346_s16 }
  0x3d   : > { %s348_s17 = scalar_lea.vmem %s347_s16, 256  ;;  %p349_p7 = scmp.lt.s32.totalorder %s544_s30, %s347_s16 }
  0x3e   : > { %p345_p13 = pneg %p344_p12  ;;  %p350_p10 = scmp.lt.s32.totalorder %s348_s17, %s342_s14 }
  0x40   : > { %p351_p2 = por %p350_p10, %p349_p7 }
  0x42   : > { %p352_p4 = pnand %p351_p2, %p345_p13 }
  0x44   : > { %355 = shalt.err (!%p352_p4)
}
  0x45   : > { %s356_s19 = scalar_lea.hbm %s549_s20, 128  ;;  %s360_s25 = scalar_lea.hbm %s593_s2, 256 }
  0x46   : > { %p357_p5 = scmp.ne.s32.totalorder %s549_s20, %s356_s19  ;;  %p361_p0 = scmp.lt.u32.totalorder %s549_s20, %s593_s2 }
  0x47   : > { %p362_p1 = scmp.lt.u32.totalorder %s360_s25, %s356_s19  ;;  %p364_p6 = scmp.lt.u32.totalorder %s356_s19, %s549_s20 }
  0x48   : > { %p358_p8 = pnand %p357_p5, %p602_p11 }
  0x49   : > { %p363_p3 = por %p362_p1, %p361_p0 }
  0x4a   : > { %p359_p9 = pneg %p358_p8 }
  0x4b   : > { %p365_p12 = por %p364_p6, %p363_p3 }
  0x4d   : > { %p366_p13 = pnand %p365_p12, %p359_p9 }
  0x4f   : > { %369 = shalt.err (!%p366_p13)
}
  0x50   : > { %268 = dma.vmem_to_hbm [thread:$0]  (%p602_p11), %s544_s30, 128, %s549_s20, %s170_s8  }
  0x51 PF: > { %s195_s29 = sand.u32 1, %s396_s9   ;;  %p603_p7 = scmp.ne.s32.totalorder %s598_s22, 0 }
  0x52   : > { %p604_p10 = scmp.ge.s32.totalorder %s408_s12, 2  ;;  %s196_s28 = scalar_lea.sflag [#allocation4], %s195_s29 }
  0x54   : > { %p275_p2 = pnand %p604_p10, %p603_p7 }
  0x56   : > { %391 = dma.done.wait (!%p275_p2), %s196_s28, 128  }
  0x57   : > { %393 = vsyncadd (!%p275_p2), %s196_s28, 4294967168  ;;  %p15_p4 = scmp.ge.s32.totalorder %s452_s15, 4   ;;  %s605_s9 = smov %s400_s10 }
  0x58   : > { %s606_s10 = smov %s404_s11  ;;  %s607_s11 = smov %s464_s18 }
  0x59   : > { %s608_s12 = smov %s452_s15  ;;  %17 = sbr.rel (!%p15_p4) target bundleno = 5 (0x5), region = 73 }
  0x60   :  { %201 = vsyncpa [#allocation3], 1 }
  0x61   :  { %203 = vsyncpa [#allocation3 + $0x1], 1 }
  0x62   :  { %204 = vsyncpa [#allocation4], 1 }
  0x63   :  { %206 = vsyncpa [#allocation4 + $0x1], 1 }

</bundles_post_ra>
